<compile_context>
chip_gen: v7x
topology: tpu7x:2x2x1
jax: 0.10.0
libtpu: 0.0.40
codegen_flags: <defaults>
</compile_context>

<pallas_src>
import functools

import jax
import jax.numpy as jnp
import numpy as np
from jax.experimental import pallas as pl
from jax.experimental.pallas import tpu as pltpu

EPS = 1e-5  # nn.InstanceNorm2d default


def down_kernel(x_ref, w_ref, b_ref, o_ref, pad_ref):
    # x_ref  : (NB, Hp, 2, Wp, 2*Cin)  NHWC with the 2x2 pool window exposed by
    #                                  a *free* wrapper reshape (no HBM copy).
    # w_ref  : (9*Cin, Cout) bf16      conv weight, (ky, kx, cin) row order.
    # b_ref  : (1, Cout) f32
    # o_ref  : (NB, Hp, Wp, Cout) f32
    # pad_ref: VMEM scratch (NB, Hp+2, Wp+2, Cin) f32 -- pooled image + halo.
    NB = x_ref.shape[0]
    Hp = x_ref.shape[1]
    Wp = x_ref.shape[3]
    Cin = x_ref.shape[4] // 2
    Cout = w_ref.shape[1]

    # ---- MaxPool2d(2), fused (f32 VPU math) ----
    x = x_ref[...]                                        # (NB, Hp, 2, Wp, 2*Cin)
    v = jnp.maximum(x[:, :, 0, :, :], x[:, :, 1, :, :])   # rows 2i vs 2i+1
    pooled = jnp.maximum(v[..., :Cin], v[..., Cin:])      # cols 2j vs 2j+1 -> (NB,Hp,Wp,Cin)

    # ---- zero ONLY the 1-pixel halo, then write the pooled interior ----
    # (per step, not pl.when(pid==0): batch axis is "parallel", so on v7x each
    #  TensorCore has its own scratch and only one of them ever sees pid==0)
    pad_ref[:, 0:1, :, :] = jnp.zeros((NB, 1, Wp + 2, Cin), jnp.float32)
    pad_ref[:, Hp + 1:Hp + 2, :, :] = jnp.zeros((NB, 1, Wp + 2, Cin), jnp.float32)
    pad_ref[:, :, 0:1, :] = jnp.zeros((NB, Hp + 2, 1, Cin), jnp.float32)
    pad_ref[:, :, Wp + 1:Wp + 2, :] = jnp.zeros((NB, Hp + 2, 1, Cin), jnp.float32)
    pad_ref[:, 1:Hp + 1, 1:Wp + 1, :] = pooled

    # ---- Conv2d 3x3 (padding=1) on the MXU, bf16 inputs / f32 accumulation ----
    if Cin >= 128:
        # K is already large: accumulate 3 matmuls (K=3*Cin) on row-shifted
        # views; avoids the 9x im2col VMEM copy (v7x-friendly).
        acc = jnp.zeros((NB * Hp * Wp, Cout), jnp.float32)
        for ky in range(3):
            wide = jnp.concatenate(
                [pad_ref[:, ky:ky + Hp, kx:kx + Wp, :] for kx in range(3)],
                axis=-1)                                   # (NB, Hp, Wp, 3*Cin)
            lhs = wide.reshape(NB * Hp * Wp, 3 * Cin).astype(jnp.bfloat16)
            acc = acc + jnp.dot(lhs, w_ref[ky * 3 * Cin:(ky + 1) * 3 * Cin, :],
                                preferred_element_type=jnp.float32)
    else:
        # Single im2col matmul; patch lane order (ky, kx, cin) matches w rows.
        wide = jnp.concatenate(
            [pad_ref[:, :, kx:kx + Wp, :] for kx in range(3)], axis=-1)  # (NB,Hp+2,Wp,3*Cin)
        patches = jnp.concatenate(
            [wide[:, ky:ky + Hp] for ky in range(3)], axis=-1)           # (NB,Hp,Wp,9*Cin)
        lhs = patches.reshape(NB * Hp * Wp, 9 * Cin).astype(jnp.bfloat16)
        acc = jnp.dot(lhs, w_ref[...], preferred_element_type=jnp.float32)

    # ---- bias + ReLU (f32) ----
    y = jnp.maximum(acc + b_ref[...], 0.0)                # (NB*Hp*Wp, Cout)

    # ---- InstanceNorm2d (affine=False, biased var, eps=1e-5), per image ----
    # Single f32 pass; var clamped at 0 to guard the E[y^2]-mean^2 cancellation.
    y3 = y.reshape(NB, Hp * Wp, Cout)
    inv_m = 1.0 / float(Hp * Wp)
    mean = jnp.sum(y3, axis=1, keepdims=True) * inv_m
    ex2 = jnp.sum(y3 * y3, axis=1, keepdims=True) * inv_m
    var = jnp.maximum(ex2 - mean * mean, 0.0)
    yn = (y3 - mean) * jax.lax.rsqrt(var + EPS)

    o_ref[...] = yn.reshape(NB, Hp, Wp, Cout).astype(o_ref.dtype)


def down_forward_nhwc(x_nhwc, w_hwio, b, *, batch_block=None):
    """NHWC-native Down: (N, H, W, Cin) -> (N, H//2, W//2, Cout). No transposes."""
    N, H, W, Cin = x_nhwc.shape
    Cout = w_hwio.shape[3]
    Hp, Wp = H // 2, W // 2

    # Floor-truncate odd spatial dims, exactly like nn.MaxPool2d(2).
    x_nhwc = x_nhwc[:, :2 * Hp, :2 * Wp, :]

    # Batch blocking: keep >= 2 grid steps when possible (v7x has 2 TCs),
    # otherwise pack everything into one step.
    if batch_block is None:
        nb = N // 2 if (N >= 2 and N % 2 == 0) else 1
    else:
        nb = int(batch_block)
    assert N % nb == 0, f"batch {N} must be divisible by batch_block {nb}"
    steps = N // nb

    # Free reshapes only (no extra HBM copy of the activation).
    x_win = x_nhwc.reshape(N, Hp, 2, Wp, 2 * Cin)
    w2 = w_hwio.reshape(9 * Cin, Cout).astype(jnp.bfloat16)   # (ky,kx,cin) rows
    b2 = b.reshape(1, Cout).astype(jnp.float32)

    # vmem_limit_bytes sized from the actual buffers (double-buffered I/O,
    # pad scratch, im2col + accumulator temporaries) with headroom.
    f32b, bf16b = 4, 2
    blk_in = nb * Hp * 2 * Wp * 2 * Cin * f32b
    blk_out = nb * Hp * Wp * Cout * f32b
    blk_w = 9 * Cin * Cout * bf16b
    blk_b = Cout * f32b
    pad_scr = nb * (Hp + 2) * (Wp + 2) * Cin * f32b
    patches = nb * Hp * Wp * 9 * Cin * (f32b + bf16b)
    acc_tmp = 2 * nb * Hp * Wp * Cout * f32b
    need = 2 * (blk_in + blk_out + blk_w + blk_b) + pad_scr + patches + acc_tmp
    vmem_limit = int(min(max(2 * need, 32 * 1024 * 1024), 112 * 1024 * 1024))

    out_nhwc = pl.pallas_call(
        down_kernel,
        out_shape=jax.ShapeDtypeStruct((N, Hp, Wp, Cout), jnp.float32),
        grid=(steps,),
        in_specs=[
            pl.BlockSpec((nb, Hp, 2, Wp, 2 * Cin), lambda n: (n, 0, 0, 0, 0)),
            pl.BlockSpec((9 * Cin, Cout), lambda n: (0, 0)),
            pl.BlockSpec((1, Cout), lambda n: (0, 0)),
        ],
        out_specs=pl.BlockSpec((nb, Hp, Wp, Cout), lambda n: (n, 0, 0, 0)),
        scratch_shapes=[pltpu.VMEM((nb, Hp + 2, Wp + 2, Cin), jnp.float32)],
        compiler_params=pltpu.CompilerParams(
            dimension_semantics=("parallel",),
            vmem_limit_bytes=vmem_limit),
    )(x_win, w2, b2)
    return out_nhwc


@functools.partial(jax.jit, static_argnames=("batch_block",))
def down_forward(x_nchw, w_hwio, b, batch_block=None):
    """PyTorch-compatible Down: (N, Cin, H, W) -> (N, Cout, H//2, W//2).

    The NCHW<->NHWC transposes exist only for interface compatibility; use
    `down_forward_nhwc` directly in an NHWC-end-to-end network to drop them.
    """
    x_nhwc = jnp.transpose(x_nchw, (0, 2, 3, 1))
    out_nhwc = down_forward_nhwc(x_nhwc, w_hwio, b, batch_block=batch_block)
    return jnp.transpose(out_nhwc, (0, 3, 1, 2))


def down_reference(x_nchw, w_hwio, b, *, matmul_dtype=jnp.float32):
    """Pure-JAX reference matching the PyTorch module semantics.

    matmul_dtype=bf16 mirrors the kernel's bf16 MXU inputs (f32 accumulate),
    giving a tight structural comparison independent of bf16 rounding policy.
    """
    N, C, H, W = x_nchw.shape
    Hp, Wp = H // 2, W // 2
    xc = x_nchw[:, :, :2 * Hp, :2 * Wp]
    xp = xc.reshape(N, C, Hp, 2, Wp, 2).max(axis=(3, 5))
    xp = xp.astype(matmul_dtype).astype(jnp.float32)
    wc = w_hwio.astype(matmul_dtype).astype(jnp.float32)
    y = jax.lax.conv_general_dilated(
        xp, wc, window_strides=(1, 1), padding=((1, 1), (1, 1)),
        dimension_numbers=("NCHW", "HWIO", "NCHW"),
        precision=jax.lax.Precision.HIGHEST)
    y = y + b.reshape(1, -1, 1, 1)
    y = jnp.maximum(y, 0.0)
    mean = y.mean(axis=(2, 3), keepdims=True)
    var = ((y - mean) ** 2).mean(axis=(2, 3), keepdims=True)
    return (y - mean) * jax.lax.rsqrt(var + EPS)


if __name__ == "__main__":
    key = jax.random.PRNGKey(0)
    kx, kw, kb, kx2 = jax.random.split(key, 4)

    # Small shapes consistent with Down(in_ch=4, out_ch=8), NCHW input.
    N, Cin, Cout, H, W = 2, 4, 8, 16, 16

    x = jax.random.normal(kx, (N, Cin, H, W), dtype=jnp.float32)

    # Deterministic Conv2d(in_ch, out_ch, 3) init (Kaiming-uniform-ish),
    # weight stored directly in HWIO = (3, 3, Cin, Cout).
    fan_in = Cin * 3 * 3
    bound = 1.0 / np.sqrt(fan_in)
    w = jax.random.uniform(kw, (3, 3, Cin, Cout), dtype=jnp.float32,
                           minval=-bound, maxval=bound)
    b = jax.random.uniform(kb, (Cout,), dtype=jnp.float32,
                           minval=-bound, maxval=bound)

    # Main check: N=2 -> nb=1, 2 grid steps.
    out = down_forward(x, w, b)
    jax.block_until_ready(out)
    ref_tight = down_reference(x, w, b, matmul_dtype=jnp.bfloat16)
    ref_f32 = down_reference(x, w, b, matmul_dtype=jnp.float32)
    np.testing.assert_allclose(np.asarray(out), np.asarray(ref_tight),
                               rtol=1e-3, atol=1e-3)
    np.testing.assert_allclose(np.asarray(out), np.asarray(ref_f32),
                               rtol=5e-2, atol=5e-2)

    # Batched-per-step path (N=4 -> nb=2, 2 grid steps) + odd spatial dims
    # (17 -> floor to 16, like nn.MaxPool2d(2)).
    x2 = jax.random.normal(kx2, (4, Cin, 17, 17), dtype=jnp.float32)
    out2 = down_forward(x2, w, b)
    jax.block_until_ready(out2)
    ref2 = down_reference(x2, w, b, matmul_dtype=jnp.bfloat16)
    np.testing.assert_allclose(np.asarray(out2), np.asarray(ref2),
                               rtol=1e-3, atol=1e-3)

    print("KERNEL_OK")
</pallas_src>

<mosaic_0001>
module attributes {stable_mosaic.version = 11 : i64} {
  func.func @down_kernel(%arg0: i32, %arg1: memref<1x8x2x8x8xf32, #tpu.memory_space<vmem>>, %arg2: memref<36x8xbf16, #tpu.memory_space<vmem>>, %arg3: memref<1x8xf32, #tpu.memory_space<vmem>>, %arg4: memref<1x8x8x8xf32, #tpu.memory_space<vmem>>, %arg5: memref<1x10x10x4xf32, #tpu.memory_space<vmem>>) attributes {dimension_semantics = [#tpu.dimension_semantics<parallel>], iteration_bounds = array<i64: 2>, scalar_prefetch = 0 : i64, scratch_operands = 1 : i64, tpu.core_type = #tpu.core_type<tc>, window_params = [{transform_indices = @transform_0, window_bounds = array<i64: 1, 8, 2, 8, 8>}, {pipeline_mode = #tpu.pipeline_mode<synchronous>, transform_indices = @transform_1, window_bounds = array<i64: 36, 8>}, {pipeline_mode = #tpu.pipeline_mode<synchronous>, transform_indices = @transform_2, window_bounds = array<i64: 1, 8>}, {transform_indices = @transform_3, window_bounds = array<i64: 1, 8, 8, 8>}]} {
    %c0 = arith.constant 0 : index
    %c0_0 = arith.constant 0 : index
    %c0_1 = arith.constant 0 : index
    %c0_2 = arith.constant 0 : index
    %c0_3 = arith.constant 0 : index
    %0 = vector.load %arg1[%c0, %c0_0, %c0_1, %c0_2, %c0_3] : memref<1x8x2x8x8xf32, #tpu.memory_space<vmem>>, vector<1x8x2x8x8xf32>
    %1 = vector.extract_strided_slice %0 {offsets = [0, 0, 0, 0, 0], sizes = [1, 8, 1, 8, 8], strides = [1, 1, 1, 1, 1]} : vector<1x8x2x8x8xf32> to vector<1x8x1x8x8xf32>
    %2 = vector.shape_cast %1 : vector<1x8x1x8x8xf32> to vector<1x8x8x8xf32>
    %3 = vector.extract_strided_slice %0 {offsets = [0, 0, 1, 0, 0], sizes = [1, 8, 1, 8, 8], strides = [1, 1, 1, 1, 1]} : vector<1x8x2x8x8xf32> to vector<1x8x1x8x8xf32>
    %4 = vector.shape_cast %3 : vector<1x8x1x8x8xf32> to vector<1x8x8x8xf32>
    %5 = arith.maximumf %2, %4 : vector<1x8x8x8xf32>
    %6 = vector.extract_strided_slice %5 {offsets = [0, 0, 0, 0], sizes = [1, 8, 8, 4], strides = [1, 1, 1, 1]} : vector<1x8x8x8xf32> to vector<1x8x8x4xf32>
    %7 = vector.extract_strided_slice %5 {offsets = [0, 0, 0, 4], sizes = [1, 8, 8, 4], strides = [1, 1, 1, 1]} : vector<1x8x8x8xf32> to vector<1x8x8x4xf32>
    %8 = arith.maximumf %6, %7 : vector<1x8x8x4xf32>
    %cst = arith.constant 0.000000e+00 : f32
    %9 = vector.broadcast %cst : f32 to vector<1x1x10x4xf32>
    %c0_4 = arith.constant 0 : index
    %c0_5 = arith.constant 0 : index
    %c0_6 = arith.constant 0 : index
    %c0_7 = arith.constant 0 : index
    %10 = vector.load %arg5[%c0_4, %c0_5, %c0_6, %c0_7] : memref<1x10x10x4xf32, #tpu.memory_space<vmem>>, vector<1x1x10x4xf32>
    tpu.vector_store %arg5[%c0_4, %c0_5, %c0_6, %c0_7], %9 {strides = array<i32>} : memref<1x10x10x4xf32, #tpu.memory_space<vmem>>, vector<1x1x10x4xf32>,
    %cst_8 = arith.constant 0.000000e+00 : f32
    %11 = vector.broadcast %cst_8 : f32 to vector<1x1x10x4xf32>
    %c0_9 = arith.constant 0 : index
    %c9 = arith.constant 9 : index
    %c0_10 = arith.constant 0 : index
    %c0_11 = arith.constant 0 : index
    %12 = vector.load %arg5[%c0_9, %c9, %c0_10, %c0_11] : memref<1x10x10x4xf32, #tpu.memory_space<vmem>>, vector<1x1x10x4xf32>
    tpu.vector_store %arg5[%c0_9, %c9, %c0_10, %c0_11], %11 {strides = array<i32>} : memref<1x10x10x4xf32, #tpu.memory_space<vmem>>, vector<1x1x10x4xf32>,
    %cst_12 = arith.constant 0.000000e+00 : f32
    %13 = vector.broadcast %cst_12 : f32 to vector<1x10x1x4xf32>
    %c0_13 = arith.constant 0 : index
    %c0_14 = arith.constant 0 : index
    %c0_15 = arith.constant 0 : index
    %c0_16 = arith.constant 0 : index
    %14 = vector.load %arg5[%c0_13, %c0_14, %c0_15, %c0_16] : memref<1x10x10x4xf32, #tpu.memory_space<vmem>>, vector<1x10x1x4xf32>
    tpu.vector_store %arg5[%c0_13, %c0_14, %c0_15, %c0_16], %13 {strides = array<i32>} : memref<1x10x10x4xf32, #tpu.memory_space<vmem>>, vector<1x10x1x4xf32>,
    %cst_17 = arith.constant 0.000000e+00 : f32
    %15 = vector.broadcast %cst_17 : f32 to vector<1x10x1x4xf32>
    %c0_18 = arith.constant 0 : index
    %c0_19 = arith.constant 0 : index
    %c9_20 = arith.constant 9 : index
    %c0_21 = arith.constant 0 : index
    %16 = vector.load %arg5[%c0_18, %c0_19, %c9_20, %c0_21] : memref<1x10x10x4xf32, #tpu.memory_space<vmem>>, vector<1x10x1x4xf32>
    tpu.vector_store %arg5[%c0_18, %c0_19, %c9_20, %c0_21], %15 {strides = array<i32>} : memref<1x10x10x4xf32, #tpu.memory_space<vmem>>, vector<1x10x1x4xf32>,
    %c0_22 = arith.constant 0 : index
    %c1 = arith.constant 1 : index
    %c1_23 = arith.constant 1 : index
    %c0_24 = arith.constant 0 : index
    %17 = vector.load %arg5[%c0_22, %c1, %c1_23, %c0_24] : memref<1x10x10x4xf32, #tpu.memory_space<vmem>>, vector<1x8x8x4xf32>
    tpu.vector_store %arg5[%c0_22, %c1, %c1_23, %c0_24], %8 {strides = array<i32>} : memref<1x10x10x4xf32, #tpu.memory_space<vmem>>, vector<1x8x8x4xf32>,
    %c0_25 = arith.constant 0 : index
    %c0_26 = arith.constant 0 : index
    %c0_27 = arith.constant 0 : index
    %c0_28 = arith.constant 0 : index
    %18 = vector.load %arg5[%c0_25, %c0_26, %c0_27, %c0_28] : memref<1x10x10x4xf32, #tpu.memory_space<vmem>>, vector<1x10x8x4xf32>
    %c0_29 = arith.constant 0 : index
    %c0_30 = arith.constant 0 : index
    %c1_31 = arith.constant 1 : index
    %c0_32 = arith.constant 0 : index
    %19 = vector.load %arg5[%c0_29, %c0_30, %c1_31, %c0_32] : memref<1x10x10x4xf32, #tpu.memory_space<vmem>>, vector<1x10x8x4xf32>
    %c0_33 = arith.constant 0 : index
    %c0_34 = arith.constant 0 : index
    %c2 = arith.constant 2 : index
    %c0_35 = arith.constant 0 : index
    %20 = vector.load %arg5[%c0_33, %c0_34, %c2, %c0_35] : memref<1x10x10x4xf32, #tpu.memory_space<vmem>>, vector<1x10x8x4xf32>
    %21 = tpu.concatenate %18, %19, %20 in 3 : vector<1x10x8x4xf32>, vector<1x10x8x4xf32>, vector<1x10x8x4xf32> -> vector<1x10x8x12xf32>
    %22 = vector.extract_strided_slice %21 {offsets = [0, 0, 0, 0], sizes = [1, 8, 8, 12], strides = [1, 1, 1, 1]} : vector<1x10x8x12xf32> to vector<1x8x8x12xf32>
    %23 = vector.extract_strided_slice %21 {offsets = [0, 1, 0, 0], sizes = [1, 8, 8, 12], strides = [1, 1, 1, 1]} : vector<1x10x8x12xf32> to vector<1x8x8x12xf32>
    %24 = vector.extract_strided_slice %21 {offsets = [0, 2, 0, 0], sizes = [1, 8, 8, 12], strides = [1, 1, 1, 1]} : vector<1x10x8x12xf32> to vector<1x8x8x12xf32>
    %25 = tpu.concatenate %22, %23, %24 in 3 : vector<1x8x8x12xf32>, vector<1x8x8x12xf32>, vector<1x8x8x12xf32> -> vector<1x8x8x36xf32>
    %26 = vector.shape_cast %25 : vector<1x8x8x36xf32> to vector<64x36xf32>
    %27 = arith.truncf %26 : vector<64x36xf32> to vector<64x36xbf16>
    %c0_36 = arith.constant 0 : index
    %c0_37 = arith.constant 0 : index
    %28 = vector.load %arg2[%c0_36, %c0_37] : memref<36x8xbf16, #tpu.memory_space<vmem>>, vector<36x8xbf16>
    %cst_38 = arith.constant dense<0.000000e+00> : vector<64x8xf32>
    %29 = tpu.matmul %27, %28, %cst_38 {dimension_numbers = #tpu.dot_dimension_numbers<[1], [0], [0], [1], [0, 0, 1, 1], [], []>} : vector<64x36xbf16>, vector<36x8xbf16>, vector<64x8xf32> -> vector<64x8xf32>
    %c0_39 = arith.constant 0 : index
    %c0_40 = arith.constant 0 : index
    %30 = vector.load %arg3[%c0_39, %c0_40] : memref<1x8xf32, #tpu.memory_space<vmem>>, vector<1x8xf32>
    %31 = vector.broadcast %30 : vector<1x8xf32> to vector<64x8xf32>
    %32 = arith.addf %29, %31 : vector<64x8xf32>
    %cst_41 = arith.constant 0.000000e+00 : f32
    %33 = vector.broadcast %cst_41 : f32 to vector<64x8xf32>
    %34 = arith.maximumf %32, %33 : vector<64x8xf32>
    %35 = vector.shape_cast %34 : vector<64x8xf32> to vector<1x64x8xf32>
    %cst_42 = arith.constant dense<0.000000e+00> : vector<1x8xf32>
    %36 = vector.multi_reduction <add>, %35, %cst_42 [1] : vector<1x64x8xf32> to vector<1x8xf32>
    %37 = vector.shape_cast %36 : vector<1x8xf32> to vector<1x1x8xf32>
    %cst_43 = arith.constant 1.562500e-02 : f32
    %38 = vector.broadcast %cst_43 : f32 to vector<1x1x8xf32>
    %39 = arith.mulf %37, %38 : vector<1x1x8xf32>
    %40 = arith.mulf %35, %35 : vector<1x64x8xf32>
    %cst_44 = arith.constant dense<0.000000e+00> : vector<1x8xf32>
    %41 = vector.multi_reduction <add>, %40, %cst_44 [1] : vector<1x64x8xf32> to vector<1x8xf32>
    %42 = vector.shape_cast %41 : vector<1x8xf32> to vector<1x1x8xf32>
    %cst_45 = arith.constant 1.562500e-02 : f32
    %43 = vector.broadcast %cst_45 : f32 to vector<1x1x8xf32>
    %44 = arith.mulf %42, %43 : vector<1x1x8xf32>
    %45 = arith.mulf %39, %39 : vector<1x1x8xf32>
    %46 = arith.subf %44, %45 : vector<1x1x8xf32>
    %cst_46 = arith.constant 0.000000e+00 : f32
    %47 = vector.broadcast %cst_46 : f32 to vector<1x1x8xf32>
    %48 = arith.maximumf %46, %47 : vector<1x1x8xf32>
    %49 = vector.broadcast %39 : vector<1x1x8xf32> to vector<1x64x8xf32>
    %50 = arith.subf %35, %49 : vector<1x64x8xf32>
    %cst_47 = arith.constant 9.99999974E-6 : f32
    %51 = vector.broadcast %cst_47 : f32 to vector<1x1x8xf32>
    %52 = arith.addf %48, %51 : vector<1x1x8xf32>
    %53 = math.rsqrt %52 : vector<1x1x8xf32>
    %54 = vector.broadcast %53 : vector<1x1x8xf32> to vector<1x64x8xf32>
    %55 = arith.mulf %50, %54 : vector<1x64x8xf32>
    %56 = vector.shape_cast %55 : vector<1x64x8xf32> to vector<1x8x8x8xf32>
    %c0_48 = arith.constant 0 : index
    %c0_49 = arith.constant 0 : index
    %c0_50 = arith.constant 0 : index
    %c0_51 = arith.constant 0 : index
    %57 = vector.load %arg4[%c0_48, %c0_49, %c0_50, %c0_51] : memref<1x8x8x8xf32, #tpu.memory_space<vmem>>, vector<1x8x8x8xf32>
    tpu.vector_store %arg4[%c0_48, %c0_49, %c0_50, %c0_51], %56 {strides = array<i32>} : memref<1x8x8x8xf32, #tpu.memory_space<vmem>>, vector<1x8x8x8xf32>,
    return
  }
  func.func @transform_0(%arg0: i32) -> (i32, i32, i32, i32, i32) {
    %c0_i32 = arith.constant 0 : i32
    %c0_i32_0 = arith.constant 0 : i32
    %c0_i32_1 = arith.constant 0 : i32
    %c0_i32_2 = arith.constant 0 : i32
    %c0_i32_3 = arith.constant 0 : i32
    return %arg0, %c0_i32, %c0_i32_0, %c0_i32_1, %c0_i32_2 : i32, i32, i32, i32, i32
  }
  func.func @transform_1(%arg0: i32) -> (i32, i32) {
    %c0_i32 = arith.constant 0 : i32
    %c0_i32_0 = arith.constant 0 : i32
    %c0_i32_1 = arith.constant 0 : i32
    return %c0_i32, %c0_i32_0 : i32, i32
  }
  func.func @transform_2(%arg0: i32) -> (i32, i32) {
    %c0_i32 = arith.constant 0 : i32
    %c0_i32_0 = arith.constant 0 : i32
    %c0_i32_1 = arith.constant 0 : i32
    return %c0_i32, %c0_i32_0 : i32, i32
  }
  func.func @transform_3(%arg0: i32) -> (i32, i32, i32, i32) {
    %c0_i32 = arith.constant 0 : i32
    %c0_i32_0 = arith.constant 0 : i32
    %c0_i32_1 = arith.constant 0 : i32
    %c0_i32_2 = arith.constant 0 : i32
    return %arg0, %c0_i32, %c0_i32_0, %c0_i32_1 : i32, i32, i32, i32
  }
}

</mosaic_0001>

<bundles_post_ra>
// kernel: down_forward.1
= control target key start
LH: loop header
LB: loop body
LE: loop exit
PB: predicated region body
PF: predicated region fallthrough
CT: control target
= control target key end

     0   :  { %s919_s12 = smov 0   ;;  %s1127_s0 = inlined_call_operand.vmem [shape: f32[2,8,2,8,8], index: 0, kind: input, shape index: {}]   ;;  %s1128_s1 = inlined_call_operand.vmem [shape: bf16[36,8], index: 1, kind: input, shape index: {}]   ;;  %s1129_s2 = inlined_call_operand.vmem [shape: f32[1,8], index: 2, kind: input, shape index: {}]   ;;  %s1130_s3 = inlined_call_operand.vmem [shape: f32[2,8,8,8], index: 3, kind: output, shape index: {}]  }
   0x1 LB: > { %s736_s13 = sadd.s32 4294967295, %s891_s12   ;;  %p740_p0 = scmp.ge.s32.totalorder %s891_s12, 1  ;;  %s891_s12 = sphi %s919_s12, %s13_s12  }
   0x2   : > { %p137_p1 = scmp.lt.s32.totalorder %s891_s12, 3 }
   0x4   : > { %p138_p2 = pnand %p740_p0, %p137_p1 }
   0x5   : > { %p927_p3 = scmp.lt.s32.totalorder (!%p138_p2), %s736_s13, 1  ;;  %vm236_vm0 = vcmask (!%p138_p2), 31744   ;;  %vm243_vm1 = vcmask (!%p138_p2), 24576   ;;  %v893_v0 = vmov (!%p138_p2), 0.0   ;;  %s894_s19 = smov (!%p138_p2), 124   ;;  %vm238_vm2 = vcmask (!%p138_p2), 25600  }
   0x6   : > { %141 = sbr.rel (%p138_p2) target bundleno = 677 (0x2a5), region = 32  ;;  %255 = vst.msk [vmem:[#allocation2 + $0x19] sm:$0x1] (!%p138_p2), %vm243_vm1, %v893_v0  ;;  %256 = vst.msk [vmem:[#allocation2 + $0x29] sm:$0x1] (!%p138_p2), %vm243_vm1, %v893_v0  ;;  %s895_s20 = smov (!%p138_p2), 4  }
   0x7   : > { %237 = vst.msk [vmem:[#allocation2] sm:$0xff] (!%p138_p2), %vm236_vm0, %v893_v0  ;;  %241 = vst.msk [vmem:[#allocation2 + $0x90] sm:$0xff] (!%p138_p2), %vm236_vm0, %v893_v0  ;;  %s896_s21 = smov (!%p138_p2), 8   ;;  %vm393_vm3 = vcmask (!%p138_p2), 64512   ;;  %vm523_vm4 = vcmask (!%p138_p2), 1041408   ;;  %s897_s28 = smov (!%p138_p2), 12  }
   0x8   : > { %245 = vst.msk [vmem:[#allocation2 + $0x10] sm:$0x1] (!%p138_p2), %vm243_vm1, %v893_v0  ;;  %246 = vst.msk [vmem:[#allocation2 + $0x20] sm:$0x1] (!%p138_p2), %vm243_vm1, %v893_v0  ;;  %s898_s29 = smov (!%p138_p2), 24   ;;  %vm461_vm5 = vcmask (!%p138_p2), 97280  }
   0x9   : > { %247 = vst.msk [vmem:[#allocation2 + $0x30] sm:$0x1] (!%p138_p2), %vm243_vm1, %v893_v0  ;;  %248 = vst.msk [vmem:[#allocation2 + $0x40] sm:$0x1] (!%p138_p2), %vm243_vm1, %v893_v0  ;;  %vm470_vm6 = vcmask (!%p138_p2), 195584   ;;  %vm510_vm7 = vcmask (!%p138_p2), 293888  }
   0xa   : > { %249 = vst.msk [vmem:[#allocation2 + $0x50] sm:$0x1] (!%p138_p2), %vm243_vm1, %v893_v0  ;;  %250 = vst.msk [vmem:[#allocation2 + $0x60] sm:$0x1] (!%p138_p2), %vm243_vm1, %v893_v0 }
   0xb   : > { %251 = vst.msk [vmem:[#allocation2 + $0x70] sm:$0x1] (!%p138_p2), %vm243_vm1, %v893_v0  ;;  %252 = vst.msk [vmem:[#allocation2 + $0x80] sm:$0x1] (!%p138_p2), %vm243_vm1, %v893_v0 }
   0xc   : > { %257 = vst.msk [vmem:[#allocation2 + $0x39] sm:$0x1] (!%p138_p2), %vm243_vm1, %v893_v0  ;;  %258 = vst.msk [vmem:[#allocation2 + $0x49] sm:$0x1] (!%p138_p2), %vm243_vm1, %v893_v0 }
   0xd   : > { %259 = vst.msk [vmem:[#allocation2 + $0x59] sm:$0x1] %vm243_vm1, %v893_v0  ;;  %260 = vst.msk [vmem:[#allocation2 + $0x69] sm:$0x1] %vm243_vm1, %v893_v0  ;;  %s1133_s13 = smov (!%p927_p3, %s736_s13), 1 }
   0xe   : > { %261 = vst.msk [vmem:[#allocation2 + $0x79] sm:$0x1] %vm243_vm1, %v893_v0  ;;  %262 = vst.msk [vmem:[#allocation2 + $0x89] sm:$0x1] %vm243_vm1, %v893_v0  ;;  %s755_s15 = sshll.u32 %s1133_s13, 7  ;;  %s756_s5 = sshll.u32 %s1133_s13, 6 }
   0xf   : > { %244 = vst.msk [vmem:[#allocation2] sm:$0x1] %vm243_vm1, %v893_v0  ;;  %253 = vst.msk [vmem:[#allocation2 + $0x90] sm:$0x1] %vm243_vm1, %v893_v0  ;;  %s165_s18 = scalar_lea.vmem %s1127_s0, %s755_s15  ;;  %s170_s8 = scalar_lea.vmem %s1130_s3, %s756_s5 }
  0x10   : > { %v176_v1 = vld [vmem:[%s165_s18 + $0x20] sm:$0xff]  ;;  %v177_v2 = vld [vmem:[%s165_s18 + $0x28] sm:$0xff]  ;;  %v178_v6 = vld [vmem:[%s165_s18 + $0x30] sm:$0xff]  ;;  %242 = vst.msk [vmem:[#allocation2 + $0x98] sm:$0x3] %vm238_vm2, %v893_v0 }
  0x11   : > { %v172_v3 = vld [vmem:[%s165_s18] sm:$0xff]  ;;  %v190_v4 = vmax.f32 %v176_v1, %v177_v2  ;;  %v173_v5 = vld [vmem:[%s165_s18 + $0x8] sm:$0xff]  ;;  %v179_v7 = vld [vmem:[%s165_s18 + $0x38] sm:$0xff]  ;;  %239 = vst.msk [vmem:[#allocation2 + $0x8] sm:$0x3] %vm238_vm2, %v893_v0 }
  0x12   : > { %v188_v8 = vmax.f32 %v172_v3, %v173_v5  ;;  %v174_v9 = vld [vmem:[%s165_s18 + $0x10] sm:$0xff]  ;;  %v175_v10 = vld [vmem:[%s165_s18 + $0x18] sm:$0xff]  ;;  %v191_v11 = vmax.f32 %v178_v6, %v179_v7  ;;  %v180_v15 = vld [vmem:[%s165_s18 + $0x40] sm:$0xff]  ;;  %263 = vst.msk [vmem:[#allocation2 + $0x99] sm:$0x1] %vm243_vm1, %v893_v0 }
  0x13   : > { %208 = vrot.lane.b32.xlu1 %v190_v4, %s894_s19  ;;  %v189_v12 = vmax.f32 %v174_v9, %v175_v10  ;;  %v182_v13 = vld [vmem:[%s165_s18 + $0x50] sm:$0xff]  ;;  %v183_v14 = vld [vmem:[%s165_s18 + $0x58] sm:$0xff]  ;;  %v181_v16 = vld [vmem:[%s165_s18 + $0x48] sm:$0xff]  ;;  %254 = vst.msk [vmem:[#allocation2 + $0x9] sm:$0x1] %vm243_vm1, %v893_v0 }
  0x14   : > { %204 = vrot.lane.b32.xlu0 %v188_v8, %s894_s19  ;;  %v193_v17 = vmax.f32 %v182_v13, %v183_v14  ;;  %v192_v18 = vmax.f32 %v180_v15, %v181_v16  ;;  %v186_v19 = vld [vmem:[%s165_s18 + $0x70] sm:$0xff]  ;;  %v187_v20 = vld [vmem:[%s165_s18 + $0x78] sm:$0xff]  ;;  %v184_v21 = vld [vmem:[%s165_s18 + $0x60] sm:$0xff] }
  0x15   : > { %v185_v22 = vld [vmem:[%s165_s18 + $0x68] sm:$0xff]  ;;  %v195_v23 = vmax.f32 %v186_v19, %v187_v20  ;;  %v880_v5 = vld [vmem:[%s1128_s1] sm:$0xff]   ;;  %v882_v13 = vld [vmem:[%s1128_s1 + $0x10] ss:$0 sps:$4 sm:$0x33]  }
  0x16   : > { %v194_v24 = vmax.f32 %v184_v21, %v185_v22  ;;  %764 = vmatprep.subr.bf16.mxu0 %v880_v5  ;;  %778 = vmatprep.subr.bf16.mxu1 %v880_v5 }
  0x17   : > { %210 = vrot.lane.b32.xlu1 %v191_v11, %s894_s19  ;;  %v292_v62 = vld [vmem:[#allocation2 + $0x91] sm:$0xff]  ;;  %765 = vmatpush3.bf16.msra.mxu0 %v880_v5 }
  0x18   : > { %206 = vrot.lane.b32.xlu0 %v189_v12, %s894_s19  ;;  %v283_v3 = vld [vmem:[#allocation2 + $0x1] sm:$0xff]  ;;  %781 = vmatpush3.bf16.msra.mxu1 %v880_v5 }
  0x19   : > { %v302_v1 = vld [vmem:[#allocation2 + $0x92] sm:$0xff] }
  0x1b   : > { %214 = vrot.lane.b32.xlu1 %v193_v17, %s894_s19 }
  0x1c   : > { %212 = vrot.lane.b32.xlu0 %v192_v18, %s894_s19 }
  0x1f   : > { %218 = vrot.lane.b32.xlu1 %v195_v23, %s894_s19 }
  0x20   : > { %216 = vrot.lane.b32.xlu0 %v194_v24, %s894_s19 }
  0x85   : > { %v209_v25 = vpop.permute.xlu1 %208 }
  0x86   : > { %v230_v26 = vmax.f32 %v190_v4, %v209_v25  ;;  %v205_v27 = vpop.permute.xlu0 %204  ;;  %v293_v4 = vld [vmem:[#allocation2 + $0x2] sm:$0xff] }
  0x87   : > { %v228_v28 = vmax.f32 %v188_v8, %v205_v27  ;;  %v881_v8 = vld [vmem:[%s1128_s1 + $0x8] sm:$0xff]  }
  0x88   : > { %267 = vst.msk [vmem:[#allocation2 + $0x31] sm:$0xff] %vm236_vm0, %v230_v26  ;;  %766 = vmatprep.subr.bf16.mxu0 %v881_v8  ;;  %779 = vmatprep.subr.bf16.mxu1 %v881_v8 }
  0x89   : > { %265 = vst.msk [vmem:[#allocation2 + $0x11] sm:$0xff] %vm236_vm0, %v228_v28  ;;  %v211_v29 = vpop.permute.xlu1 %210  ;;  %767 = vmatpush3.bf16.msra.mxu0 %v881_v8  ;;  %782 = vmatpush3.bf16.msra.mxu1 %v881_v8 }
  0x8a   : > { %v231_v30 = vmax.f32 %v191_v11, %v211_v29  ;;  %v207_v31 = vpop.permute.xlu0 %206  ;;  %784 = vmatprep.subr.msk.bf16.mxu0 %vm523_vm4, %v882_v13  ;;  %v525_v29 = vsel %vm523_vm4, %v882_v13, 0  ;;  %785 = vmatprep.subr.msk.bf16.mxu1 %vm523_vm4, %v882_v13 }
  0x8b   : > { %v229_v32 = vmax.f32 %v189_v12, %v207_v31 }
  0x8c   : > { %268 = vst.msk [vmem:[#allocation2 + $0x41] sm:$0xff] %vm236_vm0, %v231_v30 }
  0x8d   : > { %266 = vst.msk [vmem:[#allocation2 + $0x21] sm:$0xff] %vm236_vm0, %v229_v32  ;;  %v215_v33 = vpop.permute.xlu1 %214  ;;  %769 = vmatpush3.bf16.msra.mxu0 %v525_v29  ;;  %783 = vmatpush3.bf16.msra.mxu1 %v525_v29 }
  0x8e   : > { %v233_v34 = vmax.f32 %v193_v17, %v215_v33  ;;  %v213_v35 = vpop.permute.xlu0 %212 }
  0x8f   : > { %v232_v36 = vmax.f32 %v192_v18, %v213_v35  ;;  %v286_v38 = vld [vmem:[#allocation2 + $0x31] sm:$0xff] }
  0x90   : > { %270 = vst.msk [vmem:[#allocation2 + $0x61] sm:$0xff] %vm236_vm0, %v233_v34  ;;  %v284_v44 = vld [vmem:[#allocation2 + $0x11] sm:$0xff] }
  0x91   : > { %269 = vst.msk [vmem:[#allocation2 + $0x51] sm:$0xff] %vm236_vm0, %v232_v36  ;;  %v219_v37 = vpop.permute.xlu1 %218  ;;  %v294_v48 = vld [vmem:[#allocation2 + $0x12] sm:$0xff] }
  0x92   : > { %v235_v39 = vmax.f32 %v195_v23, %v219_v37  ;;  %v217_v40 = vpop.permute.xlu0 %216  ;;  %v296_v55 = vld [vmem:[#allocation2 + $0x32] sm:$0xff] }
  0x93   : > { %v234_v41 = vmax.f32 %v194_v24, %v217_v40  ;;  %v287_v42 = vld [vmem:[#allocation2 + $0x41] sm:$0xff]  ;;  %v274_v15 = vld [vmem:[#allocation2 + $0x10] sm:$0xff] }
  0x94   : > { %272 = vst.msk [vmem:[#allocation2 + $0x81] sm:$0xff] %vm236_vm0, %v235_v39  ;;  %v805_v43 = vpack.i.bf16 %v287_v42, %v286_v38  ;;  %v285_v45 = vld [vmem:[#allocation2 + $0x21] sm:$0xff]  ;;  %v276_v30 = vld [vmem:[#allocation2 + $0x30] sm:$0xff] }
  0x95   : > { %271 = vst.msk [vmem:[#allocation2 + $0x71] sm:$0xff] %vm236_vm0, %v234_v41  ;;  %v800_v46 = vpack.i.bf16 %v285_v45, %v284_v44  ;;  %v295_v47 = vld [vmem:[#allocation2 + $0x22] sm:$0xff] }
  0x96   : > { %806 = vrot.lane.b32.xlu1 %v805_v43, %s895_s20  ;;  %v810_v53 = vpack.i.bf16 %v295_v47, %v294_v48  ;;  %v297_v56 = vld [vmem:[#allocation2 + $0x42] sm:$0xff] }
  0x97   : > { %801 = vrot.lane.b32.xlu0 %v800_v46, %s895_s20  ;;  %v289_v49 = vld [vmem:[#allocation2 + $0x61] sm:$0xff]  ;;  %v820_v60 = vpack.i.bf16 %v297_v56, %v296_v55 }
  0x98   : > { %v288_v50 = vld [vmem:[#allocation2 + $0x51] sm:$0xff]  ;;  %v299_v52 = vld [vmem:[#allocation2 + $0x62] sm:$0xff] }
  0x99   : > { %v298_v51 = vld [vmem:[#allocation2 + $0x52] sm:$0xff]  ;;  %v815_v54 = vpack.i.bf16 %v289_v49, %v288_v50  ;;  %v275_v16 = vld [vmem:[#allocation2 + $0x20] sm:$0xff] }
  0x9a   : > { %v825_v57 = vpack.i.bf16 %v299_v52, %v298_v51  ;;  %v277_v31 = vld [vmem:[#allocation2 + $0x40] sm:$0xff]  ;;  %v278_v39 = vld [vmem:[#allocation2 + $0x50] sm:$0xff] }
  0x9b   : > { %811 = vrot.lane.b32.xlu0 %v810_v53, %s896_s21  ;;  %816 = vrot.lane.b32.xlu1 %v815_v54, %s895_s20  ;;  %v291_v59 = vld [vmem:[#allocation2 + $0x81] sm:$0xff]  ;;  %v282_v52 = vld [vmem:[#allocation2 + $0x90] sm:$0xff] }
  0x9c   : > { %v290_v58 = vld [vmem:[#allocation2 + $0x71] sm:$0xff]  ;;  %v301_v0 = vld [vmem:[#allocation2 + $0x82] sm:$0xff] }
  0x9d   : > { %v830_v61 = vpack.i.bf16 %v291_v59, %v290_v58  ;;  %v300_v63 = vld [vmem:[#allocation2 + $0x72] sm:$0xff]  ;;  %v279_v38 = vld [vmem:[#allocation2 + $0x60] sm:$0xff] }
  0x9e   : > { %v835_v2 = vpack.i.bf16 %v301_v0, %v300_v63  ;;  %v280_v56 = vld [vmem:[#allocation2 + $0x70] sm:$0xff]  ;;  %v281_v59 = vld [vmem:[#allocation2 + $0x80] sm:$0xff] }
  0x9f   : > { %821 = vrot.lane.b32.xlu0 %v820_v60, %s896_s21  ;;  %826 = vrot.lane.b32.xlu1 %v825_v57, %s896_s21 }
  0xa3   : > { %831 = vrot.lane.b32.xlu0 %v830_v61, %s895_s20  ;;  %331 = vrot.lane.b32.xlu1 %v292_v62, %s895_s20 }
  0xa7   : > { %836 = vrot.lane.b32.xlu0 %v835_v2, %s896_s21  ;;  %371 = vrot.lane.b32.xlu1 %v302_v1, %s896_s21 }
  0xab   : > { %313 = vrot.lane.b32.xlu0 %v283_v3, %s895_s20  ;;  %353 = vrot.lane.b32.xlu1 %v293_v4, %s896_s21 }
 0x108   : > { %v807_v6 = vpop.permute.xlu1 %806 }
 0x109   : > { %v802_v7 = vpop.permute.xlu0 %801  ;;  %v809_v14 = vunpack.i.h.bf16 %v807_v6  ;;  %v808_v19 = vunpack.i.l.bf16 %v807_v6 }
 0x10a   : > { %v804_v9 = vunpack.i.h.bf16 %v802_v7  ;;  %v803_v10 = vunpack.i.l.bf16 %v802_v7  ;;  %v273_v7 = vld [vmem:[#allocation2] sm:$0xff] }
 0x10b   : > { %v387_v36 = vsel %vm236_vm0, %v277_v31, %v809_v14  ;;  %v386_v37 = vsel %vm236_vm0, %v276_v30, %v808_v19 }
 0x10c   : > { %v385_v20 = vsel %vm236_vm0, %v275_v16, %v804_v9  ;;  %v384_v21 = vsel %vm236_vm0, %v274_v15, %v803_v10 }
 0x10d   : > { %v817_v11 = vpop.permute.xlu1 %816  ;;  %v812_v12 = vpop.permute.xlu0 %811 }
 0x10e   : > { %v814_v17 = vunpack.i.h.bf16 %v812_v12  ;;  %v813_v18 = vunpack.i.l.bf16 %v812_v12  ;;  %v819_v24 = vunpack.i.h.bf16 %v817_v11  ;;  %v818_v25 = vunpack.i.l.bf16 %v817_v11 }
 0x110   : > { %v987_v22 = vsel %vm393_vm3, %v384_v21, %v813_v18  ;;  %v990_v23 = vsel %vm393_vm3, %v385_v20, %v814_v17  ;;  %v389_v42 = vsel %vm236_vm0, %v279_v38, %v819_v24  ;;  %v388_v43 = vsel %vm236_vm0, %v278_v39, %v818_v25 }
 0x111   : > { %v827_v26 = vpop.permute.xlu1 %826  ;;  %v822_v27 = vpop.permute.xlu0 %821  ;;  %v840_v28 = vpack.i.bf16 %v990_v23, %v987_v22 }
 0x112   : > { %v829_v32 = vunpack.i.h.bf16 %v827_v26  ;;  %v828_v33 = vunpack.i.l.bf16 %v827_v26  ;;  %v824_v34 = vunpack.i.h.bf16 %v822_v27  ;;  %v823_v35 = vunpack.i.l.bf16 %v822_v27 }
 0x113   : > { %841 = vrot.lane.b32.xlu0 %v840_v28, %s897_s28 }
 0x114   : > { %v998_v40 = vsel %vm393_vm3, %v386_v37, %v823_v35  ;;  %v1001_v41 = vsel %vm393_vm3, %v387_v36, %v824_v34  ;;  %v1010_v48 = vsel %vm393_vm3, %v388_v43, %v828_v33  ;;  %v1013_v49 = vsel %vm393_vm3, %v389_v42, %v829_v32 }
 0x115   : > { %v832_v44 = vpop.permute.xlu0 %831  ;;  %v332_v45 = vpop.permute.xlu1 %331  ;;  %v845_v46 = vpack.i.bf16 %v1001_v41, %v998_v40  ;;  %v850_v47 = vpack.i.bf16 %v998_v40, %v990_v23  ;;  %v855_v54 = vpack.i.bf16 %v1010_v48, %v1001_v41  ;;  %v860_v55 = vpack.i.bf16 %v1013_v49, %v1010_v48 }
 0x116   : > { %v834_v50 = vunpack.i.h.bf16 %v832_v44  ;;  %v833_v51 = vunpack.i.l.bf16 %v832_v44  ;;  %v392_v61 = vsel %vm236_vm0, %v282_v52, %v332_v45 }
 0x117   : > { %846 = vrot.lane.b32.xlu1 %v845_v46, %s897_s28  ;;  %851 = vrot.lane.b32.xlu0 %v850_v47, %s898_s29 }
 0x118   : > { %v390_v60 = vsel %vm236_vm0, %v280_v56, %v833_v51  ;;  %v391_v63 = vsel %vm236_vm0, %v281_v59, %v834_v50  ;;  %v745_v56 = vld [vmem:[%s1129_s2] ss:$0 sm:$0xff] }
 0x119   : > { %v837_v53 = vpop.permute.xlu0 %836  ;;  %v372_v62 = vpop.permute.xlu1 %371 }
 0x11a   : > { %v839_v57 = vunpack.i.h.bf16 %v837_v53  ;;  %v838_v58 = vunpack.i.l.bf16 %v837_v53  ;;  %v403_v4 = vsel %vm393_vm3, %v392_v61, %v372_v62 }
 0x11b   : > { %856 = vrot.lane.b32.xlu1 %v855_v54, %s898_s29  ;;  %861 = vrot.lane.b32.xlu0 %v860_v55, %s897_s28 }
 0x11c   : > { %v402_v0 = vsel %vm393_vm3, %v391_v63, %v839_v57  ;;  %v401_v1 = vsel %vm393_vm3, %v390_v60, %v838_v58 }
 0x11d   : > { %v865_v2 = vpack.i.bf16 %v402_v0, %v401_v1  ;;  %v870_v3 = vpack.i.bf16 %v401_v1, %v1013_v49  ;;  %v875_v5 = vpack.i.bf16 %v403_v4, %v402_v0  ;;  %v314_v6 = vpop.permute.xlu0 %313  ;;  %v354_v8 = vpop.permute.xlu1 %353 }
 0x11e   : > { %v383_v9 = vsel %vm236_vm0, %v273_v7, %v314_v6 }
 0x11f   : > { %866 = vrot.lane.b32.xlu1 %v865_v2, %s897_s28  ;;  %871 = vrot.lane.b32.xlu0 %v870_v3, %s898_s29  ;;  %v394_v13 = vsel %vm393_vm3, %v383_v9, %v354_v8 }
 0x123   : > { %876 = vrot.lane.b32.xlu1 %v875_v5, %s898_s29 }
 0x185   : > { %v842_v10 = vpop.permute.xlu0 %841 }
 0x186   : > { %v844_v11 = vunpack.i.h.bf16 %v842_v10  ;;  %v843_v12 = vunpack.i.l.bf16 %v842_v10 }
 0x188   : > { %v462_v20 = vsel %vm461_vm5, %v394_v13, %v843_v12  ;;  %v463_v21 = vsel %vm461_vm5, %v987_v22, %v844_v11 }
 0x189   : > { %v847_v14 = vpop.permute.xlu1 %846  ;;  %v852_v15 = vpop.permute.xlu0 %851 }
 0x18a   : > { %v854_v16 = vunpack.i.h.bf16 %v852_v15  ;;  %v853_v17 = vunpack.i.l.bf16 %v852_v15  ;;  %v849_v18 = vunpack.i.h.bf16 %v847_v14  ;;  %v848_v19 = vunpack.i.l.bf16 %v847_v14 }
 0x18c   : > { %v471_v24 = vsel %vm470_vm6, %v462_v20, %v853_v17  ;;  %v472_v25 = vsel %vm470_vm6, %v463_v21, %v854_v16  ;;  %v465_v31 = vsel %vm461_vm5, %v998_v40, %v849_v18  ;;  %v464_v32 = vsel %vm461_vm5, %v990_v23, %v848_v19 }
 0x18d   : > { %v857_v26 = vpop.permute.xlu1 %856  ;;  %v862_v27 = vpop.permute.xlu0 %861  ;;  %v479_v28 = vpack.c.bf16 %v472_v25, %v471_v24 }
 0x18e   : > { %v859_v29 = vunpack.i.h.bf16 %v857_v26  ;;  %v858_v30 = vunpack.i.l.bf16 %v857_v26  ;;  %v864_v33 = vunpack.i.h.bf16 %v862_v27  ;;  %v863_v34 = vunpack.i.l.bf16 %v862_v27 }
 0x18f   : > { %770 = vmatprep.mubr.msk.bf16.mxu0 %vm510_vm7, %v479_v28 }
 0x190   : > { %v473_v22 = vsel %vm470_vm6, %v464_v32, %v858_v30  ;;  %v474_v35 = vsel %vm470_vm6, %v465_v31, %v859_v29  ;;  %v466_v23 = vsel %vm461_vm5, %v1001_v41, %v863_v34  ;;  %v467_v40 = vsel %vm461_vm5, %v1010_v48, %v864_v33 }
 0x191   : > { %v480_v36 = vpack.c.bf16 %v474_v35, %v473_v22  ;;  %v867_v37 = vpop.permute.xlu1 %866  ;;  %v872_v38 = vpop.permute.xlu0 %871 }
 0x192   : > { %v874_v39 = vunpack.i.h.bf16 %v872_v38  ;;  %v873_v42 = vunpack.i.l.bf16 %v872_v38  ;;  %v869_v43 = vunpack.i.h.bf16 %v867_v37  ;;  %v868_v44 = vunpack.i.l.bf16 %v867_v37 }
 0x193   : > { %771 = vmatmul.mubr.msk.bf16.vlgmr.msra.gmra.mrb[0].mxu0 %vm510_vm7, %v480_v36 }
 0x194   : > { %v475_v45 = vsel %vm470_vm6, %v466_v23, %v873_v42  ;;  %v476_v46 = vsel %vm470_vm6, %v467_v40, %v874_v39  ;;  %v469_v53 = vsel %vm461_vm5, %v401_v1, %v869_v43  ;;  %v468_v54 = vsel %vm461_vm5, %v1013_v49, %v868_v44 }
 0x195   : > { %v877_v47 = vpop.permute.xlu1 %876  ;;  %v481_v50 = vpack.c.bf16 %v476_v46, %v475_v45 }
 0x196   : > { %v879_v51 = vunpack.i.h.bf16 %v877_v47  ;;  %v878_v52 = vunpack.i.l.bf16 %v877_v47 }
 0x197   : > { %774 = vmatprep.mubr.msk.bf16.mxu1 %vm510_vm7, %v481_v50 }
 0x198   : > { %v477_v41 = vsel %vm470_vm6, %v468_v54, %v878_v52  ;;  %v478_v55 = vsel %vm470_vm6, %v469_v53, %v879_v51 }
 0x199   : > { %v482_v48 = vpack.c.bf16 %v478_v55, %v477_v41 }
 0x19b   : > { %775 = vmatmul.mubr.msk.bf16.vlgmr.msra.gmra.mrb[0].mxu1 %vm510_vm7, %v482_v48 }
 0x266   : > { %v772_v57 = vpop.f32.mrb[0].mxu0 }
 0x267   : > { %v570_v58 = vadd.f32 %v772_v57, %v745_v56  ;;  %v561_v59 = vpop.f32.mrb[1].mxu0 }
 0x268   : > { %v562_v60 = vadd.f32 %v745_v56, %v561_v59  ;;  %v773_v61 = vpop.f32.mrb[2].mxu0 }
 0x269   : > { %v573_v62 = vadd.f32 %v773_v61, %v745_v56  ;;  %v564_v49 = vpop.f32.mrb[3].mxu0  ;;  %v1060_v63 = vmax.f32 %v570_v58, 0.0 }
 0x26a   : > { %v1062_v0 = vmax.f32 %v562_v60, 0.0  ;;  %v565_v1 = vadd.f32 %v745_v56, %v564_v49 }
 0x26b   : > { %v1066_v3 = vmax.f32 %v573_v62, 0.0  ;;  %v624_v5 = vmul.f32 %v1060_v63, %v1060_v63  ;;  %v603_v10 = vsel %vm393_vm3, %v1060_v63, 0.0 }
 0x26c   : > { %v622_v2 = vmul.f32 %v1062_v0, %v1062_v0  ;;  %v1068_v4 = vmax.f32 %v565_v1, 0.0  ;;  %v600_v6 = vsel %vm393_vm3, %v1062_v0, 0.0 }
 0x26d   : > { %v625_v15 = vmul.f32 %v1066_v3, %v1066_v3  ;;  %v633_v25 = vsel %vm393_vm3, %v624_v5, 0.0  ;;  %v605_v26 = vsel %vm393_vm3, %v1066_v3, 0.0 }
 0x26e   : > { %v601_v7 = vsel %vm393_vm3, %v1068_v4, 0.0  ;;  %v623_v8 = vmul.f32 %v1068_v4, %v1068_v4  ;;  %v776_v9 = vpop.f32.mrb[0].mxu1  ;;  %v630_v14 = vsel %vm393_vm3, %v622_v2, 0.0 }
 0x26f   : > { %v602_v11 = vadd.f32 %v601_v7, %v600_v6  ;;  %v586_v12 = vadd.f32 %v776_v9, %v745_v56  ;;  %v577_v13 = vpop.f32.mrb[1].mxu1  ;;  %v635_v32 = vsel %vm393_vm3, %v625_v15, 0.0 }
 0x270   : > { %v631_v16 = vsel %vm393_vm3, %v623_v8, 0.0  ;;  %v578_v17 = vadd.f32 %v745_v56, %v577_v13  ;;  %v777_v18 = vpop.f32.mrb[2].mxu1 }
 0x271   : > { %v604_v19 = vadd.f32 %v603_v10, %v602_v11  ;;  %v632_v20 = vadd.f32 %v631_v16, %v630_v14  ;;  %v589_v21 = vadd.f32 %v777_v18, %v745_v56  ;;  %v580_v24 = vpop.f32.mrb[3].mxu1  ;;  %v1089_v30 = vmax.f32 %v586_v12, 0.0 }
 0x272   : > { %v1087_v27 = vmax.f32 %v578_v17, 0.0  ;;  %v581_v28 = vadd.f32 %v745_v56, %v580_v24 }
 0x273   : > { %v634_v29 = vadd.f32 %v633_v25, %v632_v20  ;;  %v606_v31 = vadd.f32 %v605_v26, %v604_v19  ;;  %v599_v37 = vmax.f32 %v589_v21, 0.0  ;;  %v628_v42 = vmul.f32 %v1089_v30, %v1089_v30 }
 0x274   : > { %v607_v33 = vsel %vm393_vm3, %v1087_v27, 0.0  ;;  %v626_v34 = vmul.f32 %v1087_v27, %v1087_v27  ;;  %v597_v22 = vmax.f32 %v581_v28, 0.0  ;;  %v611_v40 = vsel %vm393_vm3, %v1089_v30, 0.0 }
 0x275   : > { %v608_v35 = vadd.f32 %v607_v33, %v606_v31  ;;  %v636_v36 = vadd.f32 %v635_v32, %v634_v29  ;;  %v629_v45 = vmul.f32 %v599_v37, %v599_v37  ;;  %v613_v50 = vsel %vm393_vm3, %v599_v37, 0.0 }
 0x276   : > { %v637_v38 = vsel %vm393_vm3, %v626_v34, 0.0  ;;  %v609_v39 = vsel %vm393_vm3, %v597_v22, 0.0  ;;  %v627_v23 = vmul.f32 %v597_v22, %v597_v22  ;;  %v641_v52 = vsel %vm393_vm3, %v628_v42, 0.0 }
 0x277   : > { %v638_v43 = vadd.f32 %v637_v38, %v636_v36  ;;  %v610_v44 = vadd.f32 %v609_v39, %v608_v35  ;;  %v643_v41 = vsel %vm393_vm3, %v629_v45, 0.0 }
 0x278   : > { %v639_v47 = vsel %vm393_vm3, %v627_v23, 0.0 }
 0x279   : > { %v612_v46 = vadd.f32 %v611_v40, %v610_v44  ;;  %v640_v51 = vadd.f32 %v639_v47, %v638_v43 }
 0x27b   : > { %v614_v53 = vadd.f32 %v613_v50, %v612_v46  ;;  %v642_v54 = vadd.f32 %v641_v52, %v640_v51 }
 0x27d   : > { %v615_v55 = vrot.slane %v614_v53, 4  ;;  %v644_v48 = vadd.f32 %v643_v41, %v642_v54 }
 0x27f   : > { %v616_v56 = vadd.f32 %v615_v55, %v614_v53  ;;  %v645_v57 = vrot.slane %v644_v48, 4 }
 0x281   : > { %v617_v58 = vrot.slane %v616_v56, 2  ;;  %v646_v59 = vadd.f32 %v645_v57, %v644_v48 }
 0x283   : > { %v618_v60 = vadd.f32 %v617_v58, %v616_v56  ;;  %v647_v61 = vrot.slane %v646_v59, 2 }
 0x285   : > { %v619_v62 = vrot.slane %v618_v60, 1  ;;  %v648_v49 = vadd.f32 %v647_v61, %v646_v59 }
 0x287   : > { %v620_v1 = vadd.f32 %v619_v62, %v618_v60  ;;  %v649_v2 = vrot.slane %v648_v49, 1 }
 0x289   : > { %v621_v5 = vmul.f32 0.015625, %v620_v1  ;;  %v650_v6 = vadd.f32 %v649_v2, %v648_v49 }
 0x28b   : > { %v652_v7 = vmul.f32 %v621_v5, %v621_v5  ;;  %v655_v8 = vsub.f32 %v1062_v0, %v621_v5  ;;  %v656_v9 = vsub.f32 %v1068_v4, %v621_v5  ;;  %v657_v10 = vsub.f32 %v1060_v63, %v621_v5 }
 0x28c   : > { %v651_v11 = vmul.f32 0.015625, %v650_v6  ;;  %v658_v12 = vsub.f32 %v1066_v3, %v621_v5  ;;  %v659_v13 = vsub.f32 %v1087_v27, %v621_v5  ;;  %v660_v14 = vsub.f32 %v597_v22, %v621_v5 }
 0x28d   : > { %v661_v15 = vsub.f32 %v1089_v30, %v621_v5  ;;  %v662_v16 = vsub.f32 %v599_v37, %v621_v5 }
 0x28e   : > { %v653_v17 = vsub.f32 %v651_v11, %v652_v7 }
 0x290   : > { %v654_v18 = vmax.f32 %v653_v17, 0.0 }
 0x292   : > { %v663_v19 = vadd.f32 1e-05, %v654_v18 }
 0x294   : > { %883 = vrsqrt.f32 %v663_v19 }
 0x29e   : > { %v884_v20 = vpop.eup %883 }
 0x29f   : > { %v665_v63 = vmul.f32 %v884_v20, %v655_v8  ;;  %v666_v0 = vmul.f32 %v884_v20, %v656_v9  ;;  %v667_v4 = vmul.f32 %v884_v20, %v657_v10  ;;  %v668_v3 = vmul.f32 %v884_v20, %v658_v12 }
 0x2a0   : > { %v669_v21 = vmul.f32 %v884_v20, %v659_v13  ;;  %v670_v24 = vmul.f32 %v884_v20, %v660_v14  ;;  %v671_v25 = vmul.f32 %v884_v20, %v661_v15  ;;  %v672_v26 = vmul.f32 %v884_v20, %v662_v16 }
 0x2a1   : > { %673 = vst.msk [vmem:[%s170_s8] sm:$0xff] %vm393_vm3, %v665_v63  ;;  %674 = vst.msk [vmem:[%s170_s8 + $0x8] sm:$0xff] %vm393_vm3, %v666_v0 }
 0x2a2   : > { %675 = vst.msk [vmem:[%s170_s8 + $0x10] sm:$0xff] %vm393_vm3, %v667_v4  ;;  %676 = vst.msk [vmem:[%s170_s8 + $0x18] sm:$0xff] %vm393_vm3, %v668_v3 }
 0x2a3   : > { %677 = vst.msk [vmem:[%s170_s8 + $0x20] sm:$0xff] %vm393_vm3, %v669_v21  ;;  %678 = vst.msk [vmem:[%s170_s8 + $0x28] sm:$0xff] %vm393_vm3, %v670_v24 }
 0x2a4   : > { %679 = vst.msk [vmem:[%s170_s8 + $0x30] sm:$0xff] %vm393_vm3, %v671_v25  ;;  %680 = vst.msk [vmem:[%s170_s8 + $0x38] sm:$0xff] %vm393_vm3, %v672_v26 }
 0x2a5 PF: > { %s13_s12 = sadd.s32 1, %s891_s12  }
 0x2a6   : > { %p10_p4 = scmp.ge.s32.totalorder %s13_s12, 4  }
 0x2a8   :  { %12 = sbr.rel (!%p10_p4) target bundleno = 1 (0x1), region = 64 }

</bundles_post_ra>
